<compile_context>
chip_gen: v5e
topology: v5e:2x2
jax: 0.10.0
libtpu: 0.0.40
codegen_flags: <defaults>
</compile_context>

<pallas_src>
import math

import jax
import jax.numpy as jnp
from jax.experimental import pallas as pl
from jax.experimental.pallas import tpu as pltpu


def _tokenizer_kernel(p_ref, w_ref, pos_ref, out_ref):
    # p_ref: (tR, KK)  w_ref: (KK, DD)  pos_ref: (tR, DD)  out_ref: (tR, DD)
    y = jnp.dot(p_ref[...], w_ref[...], preferred_element_type=jnp.float32)
    out_ref[...] = (y + pos_ref[...]).astype(out_ref.dtype)


def unfold_patches(x, patch_size, padding, dtype=None):
    """JAX equivalent of F.unfold(x, patch, stride=patch, padding).permute(0,2,1)."""
    ph, pw = patch_size
    pad_h, pad_w = padding
    if dtype is not None:
        # Cast first so the pad/transpose copies (and the kernel's patch read)
        # move half the bytes; fuses with the transpose instead of extra pass.
        x = x.astype(dtype)
    B, C, H, W = x.shape
    x = jnp.pad(x, ((0, 0), (0, 0), (pad_h, pad_h), (pad_w, pad_w)))
    Hp, Wp = H + 2 * pad_h, W + 2 * pad_w
    nH, nW = Hp // ph, Wp // pw
    # F.unfold drops trailing partial windows when stride doesn't divide the
    # padded size; slice explicitly so the reshape below is always legal.
    x = x[:, :, : nH * ph, : nW * pw]
    x = x.reshape(B, C, nH, ph, nW, pw)
    x = x.transpose(0, 2, 4, 1, 3, 5)          # (B, nH, nW, C, ph, pw)
    return x.reshape(B, nH * nW, C * ph * pw)  # (B, L, K), K ordered (c, i, j)


def _plan_row_tile(rows, lg, sublane, bytes_per_patch_row):
    """Pick the packed-row tile size tR.

    Goals / constraints:
      * multiple of lg (packed rows per batch) so every tile starts at a batch
        boundary and the posemb tile is reused via a constant index_map;
      * multiple of `sublane` (8 f32 / 16 bf16) for unmasked sublane ops, or
        equal to the full row count (exempt from the (8,128) rule);
      * capped so a double-buffered patch tile stays within a few MiB of VMEM
        yet large (~1-2k rows) to amortize the ~0.35us per-step overhead;
      * >= 2 balanced grid steps for medium/large slabs so the "parallel"
        axis actually feeds both v7x TensorCores.
    """
    unit = lg * sublane // math.gcd(lg, sublane)                 # lcm(lg, sublane)
    cap = max(unit, min(2048, (4 << 20) // max(1, bytes_per_patch_row)))
    if rows <= cap and rows < 512:
        return rows                                              # single full-slab block
    tile = pl.cdiv(pl.cdiv(rows, 2), unit) * unit                # ~half the slab
    return min(tile, (cap // unit) * unit, rows)


def imgrec_tokenizer(x, w, b, posemb, patch_size, padding, *,
                     compute_dtype=jnp.bfloat16, out_dtype=jnp.float32):
    """x: (B, C, H, W) NCHW, w: (K, D) (= nn.Linear.weight.T), b: (D,),
    posemb: (L, D)  ->  (B, L, D).

    compute_dtype: dtype of the patch/weight HBM streams (bf16 default; MXU
      accumulates in f32 and the +posemb epilogue stays f32). Use jnp.float32
      for bit-faithful parity with the PyTorch module.
    out_dtype: output dtype (bf16 halves the output HBM stream if downstream
      consumers accept it).
    """
    B, C, H, W = x.shape
    K, D = w.shape
    patches = unfold_patches(x, patch_size, padding, dtype=compute_dtype)  # (B, L, K)
    L = patches.shape[1]
    assert patches.shape[2] == K, f"weight expects K={K}, unfold produced {patches.shape[2]}"
    assert posemb.shape == (L, D), f"posemb shape {posemb.shape} != {(L, D)}"
    M = B * L

    # Lane-dense packing: G consecutive patch rows share one 128-lane output
    # row via a block-diagonal weight. Requires L % G == 0 so packed rows never
    # straddle a batch boundary (keeps posemb batch-periodic).
    G = 1
    if D < 128 and 128 % D == 0 and L % (128 // D) == 0:
        G = 128 // D
    lg, KK, DD = L // G, G * K, G * D
    rows = M // G                                     # = B * lg

    p_in = patches.reshape(rows, KK)                  # metadata-only reshape
    if G > 1:
        w_in = jnp.kron(jnp.eye(G, dtype=compute_dtype), w.astype(compute_dtype))
    else:
        w_in = w.astype(compute_dtype)

    in_itemsize = jnp.dtype(compute_dtype).itemsize
    out_itemsize = jnp.dtype(out_dtype).itemsize
    sublane = 16 if in_itemsize == 2 else 8
    tR = _plan_row_tile(rows, lg, sublane, KK * in_itemsize)
    assert tR % lg == 0, (tR, lg)
    grid = (pl.cdiv(rows, tR),)

    # Bias folded into the positional embedding; only ONE tile's worth of it
    # (tR rows, <= a few hundred KiB) is materialized.  Its index_map is
    # constant, so it is DMA'd once and stays resident in VMEM across every
    # grid step and every batch.
    pos_packed = (posemb.astype(jnp.float32) + b.astype(jnp.float32)[None, :]
                  ).reshape(lg, DD)
    pos_tile = jnp.tile(pos_packed, (tR // lg, 1)) if tR > lg else pos_packed

    flops = 2 * M * K * D                             # true work; kron zeros excluded
    bytes_accessed = (rows * KK * in_itemsize         # patch slab
                      + KK * DD * in_itemsize         # (block-diag) weight, once
                      + tR * DD * 4                   # posemb+bias tile, once
                      + rows * DD * out_itemsize)     # output

    out = pl.pallas_call(
        _tokenizer_kernel,
        out_shape=jax.ShapeDtypeStruct((rows, DD), out_dtype),
        grid=grid,
        in_specs=[
            pl.BlockSpec((tR, KK), lambda i: (i, 0)),   # fused patch rows
            # TODO(synk): pipeline_mode=pl.Buffered(1) on the two constant-index
            # inputs would save a redundant second buffer (tens of KiB) once the
            # knob is reliably honored by the pallas_call TPU pipeline.
            pl.BlockSpec((KK, DD), lambda i: (0, 0)),   # (block-diag) weight
            pl.BlockSpec((tR, DD), lambda i: (0, 0)),   # posemb + bias, resident
        ],
        out_specs=pl.BlockSpec((tR, DD), lambda i: (i, 0)),
        compiler_params=pltpu.CompilerParams(
            dimension_semantics=("parallel",),
            vmem_limit_bytes=32 * 1024 * 1024,
            allow_input_fusion=[0],   # fuse the unfold pad/transpose into the input DMA
        ),
        cost_estimate=pl.CostEstimate(
            flops=flops, transcendentals=0, bytes_accessed=bytes_accessed),
    )(p_in, w_in, pos_tile)

    return out.reshape(B, L, D)


if __name__ == "__main__":
    def run_case(name, B, C, H, W, patch, pad, dim, key):
        kx, kw, kb, kp = jax.random.split(key, 4)
        patch_size, padding = (patch, patch), (pad, pad)
        L = ((H + 2 * pad) // patch) * ((W + 2 * pad) // patch)
        K = patch * patch * C
        x = jax.random.normal(kx, (B, C, H, W), dtype=jnp.float32)
        # Deterministic synthetic params (w == nn.Linear(K, dim).weight.T).
        w = jax.random.normal(kw, (K, dim), dtype=jnp.float32) / jnp.sqrt(K)
        b = jax.random.normal(kb, (dim,), dtype=jnp.float32) * 0.01
        posemb = jax.random.normal(kp, (L, dim), dtype=jnp.float32)

        # Pure-JAX f32 reference (matches the PyTorch module).
        ref = unfold_patches(x, patch_size, padding) @ w + b + posemb[None]

        # Numerically-faithful f32 path (tight tolerance).
        out_f32 = jax.block_until_ready(
            imgrec_tokenizer(x, w, b, posemb, patch_size, padding,
                             compute_dtype=jnp.float32))
        assert out_f32.shape == (B, L, dim), (name, out_f32.shape)
        assert jnp.allclose(out_f32, ref, atol=1e-4, rtol=1e-4), name

        # Default bf16-stream path (f32 accumulate + f32 epilogue).
        out_bf16 = jax.block_until_ready(
            imgrec_tokenizer(x, w, b, posemb, patch_size, padding))
        assert out_bf16.shape == (B, L, dim), (name, out_bf16.shape)
        assert jnp.allclose(out_bf16, ref, atol=1e-1, rtol=5e-2), name

    key = jax.random.PRNGKey(0)
    k1, k2 = jax.random.split(key)
    # Module config: input_size=16, patch_size=4, dim=32, padding=0, img_channels=3.
    run_case("16x16", B=2, C=3, H=16, W=16, patch=4, pad=0, dim=32, key=k1)
    # Larger slab: exercises padding, lane packing, resident posemb reuse across
    # batches, and a 2-step "parallel" grid (v7x megacore path).
    run_case("30x30", B=34, C=3, H=30, W=30, patch=4, pad=1, dim=32, key=k2)

    print("KERNEL_OK")
</pallas_src>

<mosaic_0001>
module attributes {stable_mosaic.version = 11 : i64} {
  func.func @_tokenizer_kernel(%arg0: i32, %arg1: memref<8x192xf32, #tpu.memory_space<vmem>>, %arg2: memref<192x128xf32, #tpu.memory_space<vmem>>, %arg3: memref<8x128xf32, #tpu.memory_space<vmem>>, %arg4: memref<8x128xf32, #tpu.memory_space<vmem>>) attributes {dimension_semantics = [#tpu.dimension_semantics<parallel>], iteration_bounds = array<i64: 1>, scalar_prefetch = 0 : i64, scratch_operands = 0 : i64, tpu.core_type = #tpu.core_type<tc>, window_params = [{transform_indices = @transform_0, window_bounds = array<i64: 8, 192>}, {pipeline_mode = #tpu.pipeline_mode<synchronous>, transform_indices = @transform_1, window_bounds = array<i64: 192, 128>}, {pipeline_mode = #tpu.pipeline_mode<synchronous>, transform_indices = @transform_2, window_bounds = array<i64: 8, 128>}, {transform_indices = @transform_3, window_bounds = array<i64: 8, 128>}]} {
    %c0 = arith.constant 0 : index
    %c0_0 = arith.constant 0 : index
    %0 = vector.load %arg1[%c0, %c0_0] : memref<8x192xf32, #tpu.memory_space<vmem>>, vector<8x192xf32>
    %c0_1 = arith.constant 0 : index
    %c0_2 = arith.constant 0 : index
    %1 = vector.load %arg2[%c0_1, %c0_2] : memref<192x128xf32, #tpu.memory_space<vmem>>, vector<192x128xf32>
    %cst = arith.constant dense<0.000000e+00> : vector<8x128xf32>
    %2 = tpu.matmul %0, %1, %cst {dimension_numbers = #tpu.dot_dimension_numbers<[1], [0], [0], [1], [0, 0, 1, 1], [], []>} : vector<8x192xf32>, vector<192x128xf32>, vector<8x128xf32> -> vector<8x128xf32>
    %c0_3 = arith.constant 0 : index
    %c0_4 = arith.constant 0 : index
    %3 = vector.load %arg3[%c0_3, %c0_4] : memref<8x128xf32, #tpu.memory_space<vmem>>, vector<8x128xf32>
    %4 = arith.addf %2, %3 : vector<8x128xf32>
    %c0_5 = arith.constant 0 : index
    %c0_6 = arith.constant 0 : index
    %5 = vector.load %arg4[%c0_5, %c0_6] : memref<8x128xf32, #tpu.memory_space<vmem>>, vector<8x128xf32>
    tpu.vector_store %arg4[%c0_5, %c0_6], %4 {strides = array<i32>} : memref<8x128xf32, #tpu.memory_space<vmem>>, vector<8x128xf32>,
    return
  }
  func.func @transform_0(%arg0: i32) -> (i32, i32) {
    %c0_i32 = arith.constant 0 : i32
    %c0_i32_0 = arith.constant 0 : i32
    return %arg0, %c0_i32 : i32, i32
  }
  func.func @transform_1(%arg0: i32) -> (i32, i32) {
    %c0_i32 = arith.constant 0 : i32
    %c0_i32_0 = arith.constant 0 : i32
    %c0_i32_1 = arith.constant 0 : i32
    return %c0_i32, %c0_i32_0 : i32, i32
  }
  func.func @transform_2(%arg0: i32) -> (i32, i32) {
    %c0_i32 = arith.constant 0 : i32
    %c0_i32_0 = arith.constant 0 : i32
    %c0_i32_1 = arith.constant 0 : i32
    return %c0_i32, %c0_i32_0 : i32, i32
  }
  func.func @transform_3(%arg0: i32) -> (i32, i32) {
    %c0_i32 = arith.constant 0 : i32
    %c0_i32_0 = arith.constant 0 : i32
    return %arg0, %c0_i32 : i32, i32
  }
}

</mosaic_0001>

<bundles_post_ra>
// kernel: tpu_custom_call.1
= control target key start
LH: loop header
LB: loop body
LE: loop exit
PB: predicated region body
PF: predicated region fallthrough
CT: control target
= control target key end

     0   :  { %8 = vsyncpa [#allocation3], 0  ;;  %s295_s0 = inlined_call_operand.hbm [shape: f32[8,192], index: 0, kind: input, shape index: {}]   ;;  %s296_s1 = inlined_call_operand.hbm [shape: f32[192,128], index: 1, kind: input, shape index: {}]   ;;  %s297_s2 = inlined_call_operand.hbm [shape: f32[8,128], index: 2, kind: input, shape index: {}]   ;;  %s298_s3 = inlined_call_operand.hbm [shape: f32[8,128], index: 3, kind: output, shape index: {}]  }
   0x1   :  { %9 = vsyncpa [#allocation6], 0  ;;  %s26_s14 = sshll.u32 %s296_s1, 4  ;;  %s27_s14 = int_to_ptr.hbm [resolvable:$true] %s26_s14 }
   0x2   :  { %10 = vsyncpa [#allocation4], 0  ;;  %s257_s15 = smov [#allocation5]   ;;  %s16_s19 = sshll.u32 %s295_s0, 4  ;;  %s17_s19 = int_to_ptr.hbm [resolvable:$true] %s16_s19 }
   0x3   :  { %s28_s16 = sshll.u32 %s257_s15, 4  ;;  %s258_s20 = smov 128   ;;  %s29_s16 = int_to_ptr.vmem [resolvable:$true] %s28_s16 }
   0x4   :  { %s259_s21 = smov 8   ;;  %s260_s22 = smov [#allocation2]  }
   0x5   :  { %34 = dma.hbm_to_vmem [thread:$0]  %s27_s14, 3072, %s29_s16, [#allocation6], %s258_s20, %s258_s20, %s259_s21  }
   0x6   :  { %s18_s23 = sshll.u32 %s260_s22, 4  ;;  %s40_s26 = sshll.u32 %s297_s2, 4  ;;  %s19_s23 = int_to_ptr.vmem [resolvable:$true] %s18_s23  ;;  %s41_s26 = int_to_ptr.hbm [resolvable:$true] %s40_s26 }
   0x7   :  { %21 = dma.hbm_to_vmem [thread:$0]  %s17_s19, 256, %s19_s23, [#allocation3]  }
   0x8   :  { %s261_s1 = smov [#allocation7]  }
   0x9   :  { %s42_s27 = sshll.u32 %s261_s1, 4  ;;  %s43_s27 = int_to_ptr.vmem [resolvable:$true] %s42_s27 }
   0xa   :  { %45 = dma.hbm_to_vmem [thread:$0]  %s41_s26, 128, %s43_s27, [#allocation6]  }
   0xb   :  { %251 = dma.done.wait [#allocation3], 256  }
   0xc   :  { %252 = vsyncadd [#allocation3], 4294967040 }
   0xd   :  { %253 = dma.done.wait [#allocation6], 3200  }
   0xe   :  { %254 = vsyncadd [#allocation6], 4294964096  ;;  %v75_v0 = vld [vmem:[#allocation5 + $0x78] sm:$0xff]  ;;  %v74_v1 = vld [vmem:[#allocation5 + $0x70] sm:$0xff]  ;;  %vm85_vm0 = vcmask 523264   ;;  %s262_s0 = smov [#allocation8]  }
   0xf   :  { %89 = vmatpush.msra.mxu0 %v75_v0  ;;  %v73_v2 = vld [vmem:[#allocation5 + $0x68] sm:$0xff]  ;;  %v83_v3 = vld [vmem:[#allocation5 + $0xb8] sm:$0xff]  ;;  %v72_v4 = vld [vmem:[#allocation5 + $0x60] sm:$0xff]  ;;  %s135_s2 = sshll.u32 %s262_s0, 4  ;;  %s137_s30 = sshll.u32 %s298_s3, 4  ;;  %s136_s2 = int_to_ptr.vmem [resolvable:$true] %s135_s2  ;;  %s138_s30 = int_to_ptr.hbm [resolvable:$true] %s137_s30 }
  0x10   :  { %117 = vmatpush.msra.mxu1 %v83_v3  ;;  %v82_v5 = vld [vmem:[#allocation5 + $0xb0] sm:$0xff]  ;;  %v81_v6 = vld [vmem:[#allocation5 + $0xa8] sm:$0xff]  ;;  %v71_v7 = vld [vmem:[#allocation5 + $0x58] sm:$0xff] }
  0x11   :  { %90 = vmatpush.msra.mxu0 %v74_v1  ;;  %v80_v8 = vld [vmem:[#allocation5 + $0xa0] sm:$0xff]  ;;  %v70_v9 = vld [vmem:[#allocation5 + $0x50] sm:$0xff]  ;;  %v79_v10 = vld [vmem:[#allocation5 + $0x98] sm:$0xff] }
  0x12   :  { %118 = vmatpush.msra.mxu1 %v82_v5  ;;  %v69_v11 = vld [vmem:[#allocation5 + $0x48] sm:$0xff]  ;;  %v78_v12 = vld [vmem:[#allocation5 + $0x90] sm:$0xff]  ;;  %v68_v13 = vld [vmem:[#allocation5 + $0x40] sm:$0xff] }
  0x13   :  { %91 = vmatpush.msra.mxu0 %v73_v2  ;;  %v77_v14 = vld [vmem:[#allocation5 + $0x88] sm:$0xff]  ;;  %v67_v15 = vld [vmem:[#allocation5 + $0x38] sm:$0xff]  ;;  %v76_v16 = vld [vmem:[#allocation5 + $0x80] sm:$0xff] }
  0x14   :  { %119 = vmatpush.msra.mxu1 %v81_v6  ;;  %v66_v17 = vld [vmem:[#allocation5 + $0x30] sm:$0xff]  ;;  %v59_v18 = vld [vmem:[#allocation2 + $0x8] sm:$0xff]  ;;  %v65_v19 = vld [vmem:[#allocation5 + $0x28] sm:$0xff] }
  0x15   :  { %92 = vmatpush.msra.mxu0 %v72_v4  ;;  %v64_v20 = vld [vmem:[#allocation5 + $0x20] sm:$0xff]  ;;  %v63_v21 = vld [vmem:[#allocation5 + $0x18] sm:$0xff]  ;;  %v62_v22 = vld [vmem:[#allocation5 + $0x10] sm:$0xff] }
  0x16   :  { %120 = vmatpush.msra.mxu1 %v80_v8  ;;  %v61_v23 = vld [vmem:[#allocation5 + $0x8] sm:$0xff]  ;;  %v60_v24 = vld [vmem:[#allocation5] sm:$0xff]  ;;  %v58_v25 = vld [vmem:[#allocation2] sm:$0xff] }
  0x17   :  { %93 = vmatpush.msra.mxu0 %v71_v7  ;;  %v84_v26 = vld [vmem:[#allocation7] sm:$0xff] }
  0x18   :  { %121 = vmatpush.msra.mxu1 %v79_v10 }
  0x19   :  { %94 = vmatpush.msra.mxu0 %v70_v9 }
  0x1a   :  { %122 = vmatpush.msra.mxu1 %v78_v12 }
  0x1b   :  { %95 = vmatpush.msra.mxu0 %v69_v11 }
  0x1c   :  { %123 = vmatpush.msra.mxu1 %v77_v14 }
  0x1d   :  { %96 = vmatpush.msra.mxu0 %v68_v13 }
  0x1e   :  { %124 = vmatpush.msra.mxu1 %v76_v16 }
  0x1f   :  { %97 = vmatpush.msra.mxu0 %v67_v15  ;;  %148 = vmatmul.msk.f32.vlgmr.msra.gmra.mxu1 %vm85_vm0, %v59_v18 }
  0x21   :  { %98 = vmatpush.msra.mxu0 %v66_v17 }
  0x23   :  { %99 = vmatpush.msra.mxu0 %v65_v19 }
  0x25   :  { %100 = vmatpush.msra.mxu0 %v64_v20 }
  0x27   :  { %101 = vmatpush.msra.mxu0 %v63_v21 }
  0x29   :  { %102 = vmatpush.msra.mxu0 %v62_v22 }
  0x2b   :  { %103 = vmatpush.msra.mxu0 %v61_v23 }
  0x2d   :  { %104 = vmatpush.msra.mxu0 %v60_v24 }
  0x2e   :  { %105 = vmatmul.f32.vlgmr.msra.gmra.mxu0 %v58_v25 }
  0x9c   :  { %v126_v28 = vpop.f32.mrf.mxu1 }
  0xab   :  { %v106_v27 = vpop.f32.mrf.mxu0 }
  0xac   :  { %v107_v29 = vadd.f32 %v106_v27, %v84_v26 }
  0xae   :  { %v127_v30 = vadd.f32 %v126_v28, %v107_v29 }
  0xb0   :  { %129 = vst [vmem:[#allocation8] sm:$0xff] %v127_v30 }
  0xb1   :  { %140 = dma.vmem_to_hbm [thread:$0]  %s136_s2, 128, %s138_s30, [#allocation4]  }
  0xb2   :  { %255 = dma.done.wait [#allocation4], 128  }
  0xb3   :  { %256 = vsyncadd [#allocation4], 4294967168 }
  0xb4   :  { %145 = vsyncpa [#allocation3], 1 }
  0xb5   :  { %146 = vsyncpa [#allocation6], 1 }
  0xb6   :  { %147 = vsyncpa [#allocation4], 1 }

</bundles_post_ra>
